<compile_context>
chip_gen: v6e
topology: v6e:2x2x1
jax: 0.10.0
libtpu: 0.0.40
codegen_flags: <defaults>
</compile_context>

<pallas_src>
import jax
import jax.numpy as jnp
from jax.experimental import pallas as pl
from jax.experimental.pallas import tpu as pltpu

N_TAIL = 40
D_IN = 2
D_HID = 128
D_OUT = 4            # 2 * 2
TB_MAX = 2048        # max batch-tile rows per grid step


def _round_up(v, m):
    return ((v + m - 1) // m) * m


def _mlp_kernel(t_ref, x_ref, w1_ref, hb_ref, w2_ref,
                w3_ref, b3_ref, w4_ref, b4_ref, o_ref):
    """head (Linear+ReLU, Linear+ReLU) then tail[t] (Linear+ReLU, Linear).

    t_ref is the scalar-prefetch ref; it is consumed by the index_maps (which
    select the tail[t] blocks to DMA from the stacked HBM arrays), not here.
    """
    del t_ref
    x = x_ref[...]                                          # (TB, 2) f32

    # head layer 1: K=2 is degenerate for the MXU -> VPU broadcast mul-add.
    h = (x[:, 0:1] * w1_ref[0:1, :]
         + x[:, 1:2] * w1_ref[1:2, :]
         + hb_ref[0:1, :])
    h = jnp.maximum(h, 0.0)

    # head layer 2: (TB,128) @ (128,128) -- native bf16 MXU, f32 accumulation.
    h = jnp.dot(h.astype(jnp.bfloat16), w2_ref[...],
                preferred_element_type=jnp.float32) + hb_ref[1:2, :]
    h = jnp.maximum(h, 0.0)

    # tail[t] layer 1: (TB,128) @ (128,128) -- bf16 MXU, f32 accumulation.
    h = jnp.dot(h.astype(jnp.bfloat16), w3_ref[...],
                preferred_element_type=jnp.float32) + b3_ref[...]
    h = jnp.maximum(h, 0.0)

    # tail[t] layer 2: (TB,128) @ (128,4) -- bf16 MXU, f32 accumulation.
    o_ref[...] = (jnp.dot(h.astype(jnp.bfloat16), w4_ref[...],
                          preferred_element_type=jnp.float32)
                  + b4_ref[...]).astype(o_ref.dtype)


@jax.jit
def model_nn_forward(x, t, params):
    """Equivalent of ModelNN.forward(x, t).

    x: (B, 2) float32
    t: int32 scalar index into the tail ModuleList (clamped to [0, N_TAIL))
    params: dict (see init_params) with stacked tail weights.
    """
    B = x.shape[0]
    # Batch tile: multiple of 8 sublanes, capped at TB_MAX, and sized so large
    # batches give >= 2 grid blocks (keeps both TensorCores busy on v7x).
    tb = max(8, min(TB_MAX, _round_up((B + 1) // 2, 8)))
    b_pad = _round_up(B, tb)
    if b_pad != B:
        x = jnp.pad(x, ((0, b_pad - B), (0, 0)))
    n_blocks = b_pad // tb

    t_arr = jnp.clip(jnp.asarray(t, jnp.int32), 0, N_TAIL - 1).reshape((1,))

    grid_spec = pltpu.PrefetchScalarGridSpec(
        num_scalar_prefetch=1,
        grid=(n_blocks,),
        in_specs=[
            # batch-tiled activation
            pl.BlockSpec((tb, D_IN), lambda i, t_ref: (i, 0)),
            # head weights / fused head biases: resident across the batch axis
            pl.BlockSpec((D_IN, D_HID), lambda i, t_ref: (0, 0)),
            pl.BlockSpec((2, D_HID), lambda i, t_ref: (0, 0)),
            pl.BlockSpec((D_HID, D_HID), lambda i, t_ref: (0, 0)),
            # tail[t] selected via the scalar-prefetched index (DMA from HBM)
            pl.BlockSpec((None, D_HID, D_HID), lambda i, t_ref: (t_ref[0], 0, 0)),
            pl.BlockSpec((None, 1, D_HID), lambda i, t_ref: (t_ref[0], 0, 0)),
            pl.BlockSpec((None, D_HID, D_OUT), lambda i, t_ref: (t_ref[0], 0, 0)),
            pl.BlockSpec((None, 1, D_OUT), lambda i, t_ref: (t_ref[0], 0, 0)),
        ],
        out_specs=pl.BlockSpec((tb, D_OUT), lambda i, t_ref: (i, 0)),
    )

    out = pl.pallas_call(
        _mlp_kernel,
        out_shape=jax.ShapeDtypeStruct((b_pad, D_OUT), jnp.float32),
        grid_spec=grid_spec,
        compiler_params=pltpu.CompilerParams(
            dimension_semantics=("parallel",)),
    )(t_arr, x,
      params["head_w1"], params["head_b"], params["head_w2"],
      params["tail_w1"], params["tail_b1"],
      params["tail_w2"], params["tail_b2"])

    return out[:B]


def init_params(key):
    """Deterministic init mirroring PyTorch nn.Linear default init
    U(-1/sqrt(fan_in), 1/sqrt(fan_in)). Weights stored transposed
    (in_features, out_features); all 128-wide weights stored in bfloat16
    (matmuls run bf16 with f32 accumulation -> ~bf16-level parity with the
    float32 PyTorch model)."""
    keys = jax.random.split(key, 4)

    def lin(k, fan_in, fan_out):
        kw, kb = jax.random.split(k)
        bound = 1.0 / jnp.sqrt(jnp.float32(fan_in))
        w = jax.random.uniform(kw, (fan_in, fan_out), jnp.float32, -bound, bound)
        b = jax.random.uniform(kb, (fan_out,), jnp.float32, -bound, bound)
        return w, b

    head_w1, head_b1 = lin(keys[0], D_IN, D_HID)
    head_w2, head_b2 = lin(keys[1], D_HID, D_HID)

    tkeys1 = jax.random.split(keys[2], N_TAIL)
    tkeys2 = jax.random.split(keys[3], N_TAIL)
    tail_w1, tail_b1 = jax.vmap(lambda k: lin(k, D_HID, D_HID))(tkeys1)
    tail_w2, tail_b2 = jax.vmap(lambda k: lin(k, D_HID, D_OUT))(tkeys2)

    return {
        "head_w1": head_w1,                                   # (2, 128)      f32
        "head_b": jnp.stack([head_b1, head_b2], axis=0),      # (2, 128)      f32
        "head_w2": head_w2.astype(jnp.bfloat16),              # (128, 128)    bf16
        "tail_w1": tail_w1.astype(jnp.bfloat16),              # (40,128,128)  bf16
        "tail_b1": tail_b1.reshape(N_TAIL, 1, D_HID),         # (40,1,128)    f32
        "tail_w2": tail_w2.astype(jnp.bfloat16),              # (40,128,4)    bf16
        "tail_b2": tail_b2.reshape(N_TAIL, 1, D_OUT),         # (40,1,4)      f32
    }


def reference_forward(x, t, params):
    """Pure-JAX reference using the same numerics as the kernel
    (bf16 weights/activations into the matmul, f32 accumulation)."""
    w1 = params["head_w1"]
    hb = params["head_b"]
    h = x[:, 0:1] * w1[0:1, :] + x[:, 1:2] * w1[1:2, :] + hb[0:1, :]
    h = jnp.maximum(h, 0.0)
    h = jnp.dot(h.astype(jnp.bfloat16), params["head_w2"],
                preferred_element_type=jnp.float32) + hb[1:2, :]
    h = jnp.maximum(h, 0.0)
    h = jnp.dot(h.astype(jnp.bfloat16), params["tail_w1"][t],
                preferred_element_type=jnp.float32) + params["tail_b1"][t]
    h = jnp.maximum(h, 0.0)
    return (jnp.dot(h.astype(jnp.bfloat16), params["tail_w2"][t],
                    preferred_element_type=jnp.float32)
            + params["tail_b2"][t])


if __name__ == "__main__":
    key = jax.random.PRNGKey(0)
    pkey, xkey = jax.random.split(key)

    params = init_params(pkey)

    # small single-block case and a padded two-block case
    for B, t in ((8, jnp.int32(3)), (37, jnp.int32(39))):
        x = jax.random.normal(jax.random.fold_in(xkey, B), (B, D_IN), jnp.float32)
        out = jax.block_until_ready(model_nn_forward(x, t, params))
        ref = reference_forward(x, t, params)
        assert out.shape == (B, D_OUT)
        err = float(jnp.max(jnp.abs(out - ref)))
        assert jnp.allclose(out, ref, atol=1e-3, rtol=1e-3), err

    print("KERNEL_OK")
</pallas_src>

<mosaic_0001>
module attributes {stable_mosaic.version = 11 : i64} {
  func.func @_mlp_kernel(%arg0: i32, %arg1: memref<1xi32, #tpu.memory_space<smem>>, %arg2: memref<8x2xf32, #tpu.memory_space<vmem>>, %arg3: memref<2x128xf32, #tpu.memory_space<vmem>>, %arg4: memref<2x128xf32, #tpu.memory_space<vmem>>, %arg5: memref<128x128xbf16, #tpu.memory_space<vmem>>, %arg6: memref<1x128x128xbf16, #tpu.memory_space<vmem>>, %arg7: memref<1x1x128xf32, #tpu.memory_space<vmem>>, %arg8: memref<1x128x4xbf16, #tpu.memory_space<vmem>>, %arg9: memref<1x1x4xf32, #tpu.memory_space<vmem>>, %arg10: memref<8x4xf32, #tpu.memory_space<vmem>>) attributes {dimension_semantics = [#tpu.dimension_semantics<parallel>], iteration_bounds = array<i64: 1>, scalar_prefetch = 1 : i64, scratch_operands = 0 : i64, tpu.core_type = #tpu.core_type<tc>, window_params = [{transform_indices = @transform_0, window_bounds = array<i64: 8, 2>}, {pipeline_mode = #tpu.pipeline_mode<synchronous>, transform_indices = @transform_1, window_bounds = array<i64: 2, 128>}, {pipeline_mode = #tpu.pipeline_mode<synchronous>, transform_indices = @transform_2, window_bounds = array<i64: 2, 128>}, {pipeline_mode = #tpu.pipeline_mode<synchronous>, transform_indices = @transform_3, window_bounds = array<i64: 128, 128>}, {transform_indices = @transform_4, window_bounds = array<i64: 1, 128, 128>}, {transform_indices = @transform_5, window_bounds = array<i64: 1, 1, 128>}, {transform_indices = @transform_6, window_bounds = array<i64: 1, 128, 4>}, {transform_indices = @transform_7, window_bounds = array<i64: 1, 1, 4>}, {transform_indices = @transform_8, window_bounds = array<i64: 8, 4>}]} {
    %c0 = arith.constant 0 : index
    %c0_0 = arith.constant 0 : index
    %0 = vector.load %arg2[%c0, %c0_0] : memref<8x2xf32, #tpu.memory_space<vmem>>, vector<8x2xf32>
    %1 = vector.extract_strided_slice %0 {offsets = [0, 0], sizes = [8, 1], strides = [1, 1]} : vector<8x2xf32> to vector<8x1xf32>
    %c0_1 = arith.constant 0 : index
    %c0_2 = arith.constant 0 : index
    %2 = vector.load %arg3[%c0_1, %c0_2] : memref<2x128xf32, #tpu.memory_space<vmem>>, vector<1x128xf32>
    %3 = vector.broadcast %1 : vector<8x1xf32> to vector<8x128xf32>
    %4 = vector.broadcast %2 : vector<1x128xf32> to vector<8x128xf32>
    %5 = arith.mulf %3, %4 : vector<8x128xf32>
    %6 = vector.extract_strided_slice %0 {offsets = [0, 1], sizes = [8, 1], strides = [1, 1]} : vector<8x2xf32> to vector<8x1xf32>
    %c1 = arith.constant 1 : index
    %c0_3 = arith.constant 0 : index
    %7 = vector.load %arg3[%c1, %c0_3] : memref<2x128xf32, #tpu.memory_space<vmem>>, vector<1x128xf32>
    %8 = vector.broadcast %6 : vector<8x1xf32> to vector<8x128xf32>
    %9 = vector.broadcast %7 : vector<1x128xf32> to vector<8x128xf32>
    %10 = arith.mulf %8, %9 : vector<8x128xf32>
    %11 = arith.addf %5, %10 : vector<8x128xf32>
    %c0_4 = arith.constant 0 : index
    %c0_5 = arith.constant 0 : index
    %12 = vector.load %arg4[%c0_4, %c0_5] : memref<2x128xf32, #tpu.memory_space<vmem>>, vector<1x128xf32>
    %13 = vector.broadcast %12 : vector<1x128xf32> to vector<8x128xf32>
    %14 = arith.addf %11, %13 : vector<8x128xf32>
    %cst = arith.constant 0.000000e+00 : f32
    %15 = vector.broadcast %cst : f32 to vector<8x128xf32>
    %16 = arith.maximumf %14, %15 : vector<8x128xf32>
    %17 = arith.truncf %16 : vector<8x128xf32> to vector<8x128xbf16>
    %c0_6 = arith.constant 0 : index
    %c0_7 = arith.constant 0 : index
    %18 = vector.load %arg5[%c0_6, %c0_7] : memref<128x128xbf16, #tpu.memory_space<vmem>>, vector<128x128xbf16>
    %cst_8 = arith.constant dense<0.000000e+00> : vector<8x128xf32>
    %19 = tpu.matmul %17, %18, %cst_8 {dimension_numbers = #tpu.dot_dimension_numbers<[1], [0], [0], [1], [0, 0, 1, 1], [], []>} : vector<8x128xbf16>, vector<128x128xbf16>, vector<8x128xf32> -> vector<8x128xf32>
    %c1_9 = arith.constant 1 : index
    %c0_10 = arith.constant 0 : index
    %20 = vector.load %arg4[%c1_9, %c0_10] : memref<2x128xf32, #tpu.memory_space<vmem>>, vector<1x128xf32>
    %21 = vector.broadcast %20 : vector<1x128xf32> to vector<8x128xf32>
    %22 = arith.addf %19, %21 : vector<8x128xf32>
    %cst_11 = arith.constant 0.000000e+00 : f32
    %23 = vector.broadcast %cst_11 : f32 to vector<8x128xf32>
    %24 = arith.maximumf %22, %23 : vector<8x128xf32>
    %25 = arith.truncf %24 : vector<8x128xf32> to vector<8x128xbf16>
    %c0_12 = arith.constant 0 : index
    %c0_13 = arith.constant 0 : index
    %c0_14 = arith.constant 0 : index
    %26 = vector.load %arg6[%c0_12, %c0_13, %c0_14] : memref<1x128x128xbf16, #tpu.memory_space<vmem>>, vector<1x128x128xbf16>
    %27 = vector.shape_cast %26 : vector<1x128x128xbf16> to vector<128x128xbf16>
    %cst_15 = arith.constant dense<0.000000e+00> : vector<8x128xf32>
    %28 = tpu.matmul %25, %27, %cst_15 {dimension_numbers = #tpu.dot_dimension_numbers<[1], [0], [0], [1], [0, 0, 1, 1], [], []>} : vector<8x128xbf16>, vector<128x128xbf16>, vector<8x128xf32> -> vector<8x128xf32>
    %c0_16 = arith.constant 0 : index
    %c0_17 = arith.constant 0 : index
    %c0_18 = arith.constant 0 : index
    %29 = vector.load %arg7[%c0_16, %c0_17, %c0_18] : memref<1x1x128xf32, #tpu.memory_space<vmem>>, vector<1x1x128xf32>
    %30 = vector.shape_cast %29 : vector<1x1x128xf32> to vector<1x128xf32>
    %31 = vector.broadcast %30 : vector<1x128xf32> to vector<8x128xf32>
    %32 = arith.addf %28, %31 : vector<8x128xf32>
    %cst_19 = arith.constant 0.000000e+00 : f32
    %33 = vector.broadcast %cst_19 : f32 to vector<8x128xf32>
    %34 = arith.maximumf %32, %33 : vector<8x128xf32>
    %35 = arith.truncf %34 : vector<8x128xf32> to vector<8x128xbf16>
    %c0_20 = arith.constant 0 : index
    %c0_21 = arith.constant 0 : index
    %c0_22 = arith.constant 0 : index
    %36 = vector.load %arg8[%c0_20, %c0_21, %c0_22] : memref<1x128x4xbf16, #tpu.memory_space<vmem>>, vector<1x128x4xbf16>
    %37 = vector.shape_cast %36 : vector<1x128x4xbf16> to vector<128x4xbf16>
    %cst_23 = arith.constant dense<0.000000e+00> : vector<8x4xf32>
    %38 = tpu.matmul %35, %37, %cst_23 {dimension_numbers = #tpu.dot_dimension_numbers<[1], [0], [0], [1], [0, 0, 1, 1], [], []>} : vector<8x128xbf16>, vector<128x4xbf16>, vector<8x4xf32> -> vector<8x4xf32>
    %c0_24 = arith.constant 0 : index
    %c0_25 = arith.constant 0 : index
    %c0_26 = arith.constant 0 : index
    %39 = vector.load %arg9[%c0_24, %c0_25, %c0_26] : memref<1x1x4xf32, #tpu.memory_space<vmem>>, vector<1x1x4xf32>
    %40 = vector.shape_cast %39 : vector<1x1x4xf32> to vector<1x4xf32>
    %41 = vector.broadcast %40 : vector<1x4xf32> to vector<8x4xf32>
    %42 = arith.addf %38, %41 : vector<8x4xf32>
    %c0_27 = arith.constant 0 : index
    %c0_28 = arith.constant 0 : index
    %43 = vector.load %arg10[%c0_27, %c0_28] : memref<8x4xf32, #tpu.memory_space<vmem>>, vector<8x4xf32>
    tpu.vector_store %arg10[%c0_27, %c0_28], %42 {strides = array<i32>} : memref<8x4xf32, #tpu.memory_space<vmem>>, vector<8x4xf32>,
    return
  }
  func.func @transform_0(%arg0: i32, %arg1: memref<1xi32, #tpu.memory_space<smem>>) -> (i32, i32) {
    %c0_i32 = arith.constant 0 : i32
    %c0_i32_0 = arith.constant 0 : i32
    return %arg0, %c0_i32 : i32, i32
  }
  func.func @transform_1(%arg0: i32, %arg1: memref<1xi32, #tpu.memory_space<smem>>) -> (i32, i32) {
    %c0_i32 = arith.constant 0 : i32
    %c0_i32_0 = arith.constant 0 : i32
    %c0_i32_1 = arith.constant 0 : i32
    return %c0_i32, %c0_i32_0 : i32, i32
  }
  func.func @transform_2(%arg0: i32, %arg1: memref<1xi32, #tpu.memory_space<smem>>) -> (i32, i32) {
    %c0_i32 = arith.constant 0 : i32
    %c0_i32_0 = arith.constant 0 : i32
    %c0_i32_1 = arith.constant 0 : i32
    return %c0_i32, %c0_i32_0 : i32, i32
  }
  func.func @transform_3(%arg0: i32, %arg1: memref<1xi32, #tpu.memory_space<smem>>) -> (i32, i32) {
    %c0_i32 = arith.constant 0 : i32
    %c0_i32_0 = arith.constant 0 : i32
    %c0_i32_1 = arith.constant 0 : i32
    return %c0_i32, %c0_i32_0 : i32, i32
  }
  func.func @transform_4(%arg0: i32, %arg1: memref<1xi32, #tpu.memory_space<smem>>) -> (i32, i32, i32) {
    %c0 = arith.constant 0 : index
    %0 = memref.load %arg1[%c0] : memref<1xi32, #tpu.memory_space<smem>>
    %c0_i32 = arith.constant 0 : i32
    %c0_i32_0 = arith.constant 0 : i32
    %c0_i32_1 = arith.constant 0 : i32
    return %0, %c0_i32, %c0_i32_0 : i32, i32, i32
  }
  func.func @transform_5(%arg0: i32, %arg1: memref<1xi32, #tpu.memory_space<smem>>) -> (i32, i32, i32) {
    %c0 = arith.constant 0 : index
    %0 = memref.load %arg1[%c0] : memref<1xi32, #tpu.memory_space<smem>>
    %c0_i32 = arith.constant 0 : i32
    %c0_i32_0 = arith.constant 0 : i32
    %c0_i32_1 = arith.constant 0 : i32
    return %0, %c0_i32, %c0_i32_0 : i32, i32, i32
  }
  func.func @transform_6(%arg0: i32, %arg1: memref<1xi32, #tpu.memory_space<smem>>) -> (i32, i32, i32) {
    %c0 = arith.constant 0 : index
    %0 = memref.load %arg1[%c0] : memref<1xi32, #tpu.memory_space<smem>>
    %c0_i32 = arith.constant 0 : i32
    %c0_i32_0 = arith.constant 0 : i32
    %c0_i32_1 = arith.constant 0 : i32
    return %0, %c0_i32, %c0_i32_0 : i32, i32, i32
  }
  func.func @transform_7(%arg0: i32, %arg1: memref<1xi32, #tpu.memory_space<smem>>) -> (i32, i32, i32) {
    %c0 = arith.constant 0 : index
    %0 = memref.load %arg1[%c0] : memref<1xi32, #tpu.memory_space<smem>>
    %c0_i32 = arith.constant 0 : i32
    %c0_i32_0 = arith.constant 0 : i32
    %c0_i32_1 = arith.constant 0 : i32
    return %0, %c0_i32, %c0_i32_0 : i32, i32, i32
  }
  func.func @transform_8(%arg0: i32, %arg1: memref<1xi32, #tpu.memory_space<smem>>) -> (i32, i32) {
    %c0_i32 = arith.constant 0 : i32
    %c0_i32_0 = arith.constant 0 : i32
    return %arg0, %c0_i32 : i32, i32
  }
}

</mosaic_0001>

<bundles_post_ra>
// kernel: model_nn_forward.1
= control target key start
LH: loop header
LB: loop body
LE: loop exit
PB: predicated region body
PF: predicated region fallthrough
CT: control target
= control target key end

     0   :  { %v643_v0 = vmov 0   ;;  %v644_v2 = vmov 0.0   ;;  %v645_v5 = vmov 1   ;;  %vm646_vm0 = vmmov 0   ;;  %s812_s1 = inlined_call_operand.vmem [shape: f32[8,2], index: 1, kind: input, shape index: {}]   ;;  %s813_s4 = inlined_call_operand.vmem [shape: bf16[128,128], index: 4, kind: input, shape index: {}]   ;;  %s814_s0 = inlined_call_operand.<no memory space> [shape: s32[1], index: 0, kind: input, shape index: {}]   ;;  %s815_s5 = inlined_call_operand.vmem [shape: bf16[40,128,128], index: 5, kind: input, shape index: {}]   ;;  %s816_s7 = inlined_call_operand.vmem [shape: bf16[40,128,4], index: 7, kind: input, shape index: {}]   ;;  %s817_s2 = inlined_call_operand.vmem [shape: f32[2,128], index: 2, kind: input, shape index: {}]   ;;  %s818_s3 = inlined_call_operand.vmem [shape: f32[2,128], index: 3, kind: input, shape index: {}]   ;;  %s819_s6 = inlined_call_operand.vmem [shape: f32[40,1,128], index: 6, kind: input, shape index: {}]   ;;  %s820_s8 = inlined_call_operand.vmem [shape: f32[40,1,4], index: 8, kind: input, shape index: {}]   ;;  %s821_s9 = inlined_call_operand.vmem [shape: f32[8,4], index: 9, kind: output, shape index: {}]  }
   0x1   :  { %617 = vset.pattern.permute.xlu0 %v643_v0  ;;  %v100_v1 = vld [vmem:[%s812_s1] sm:$0xff]  ;;  %553 = vmatprep.subr.bf16.mxu0 %v644_v2  ;;  %v619_v3 = vld [vmem:[%s813_s4 + $0x38] sm:$0xff]   ;;  %v620_v4 = vld [vmem:[%s813_s4 + $0x30] sm:$0xff]   ;;  %p76_p0 = scmp.lt.s32.totalorder %s814_s0, 39  ;;  %vm466_vm1 = vcmask 31744  }
   0x2   :  { %104 = vperm.xlu0 %617, %v100_v1   ;;  %573 = vmatprep.subr.bf16.mxu1 %v644_v2  ;;  %v621_v6 = vld [vmem:[%s813_s4 + $0x28] sm:$0xff]   ;;  %v622_v7 = vld [vmem:[%s813_s4 + $0x20] sm:$0xff]   ;;  %v623_v8 = vld [vmem:[%s813_s4 + $0x18] sm:$0xff]  }
   0x3   :  { %554 = vmatpush3.bf16.msra.mxu0 %v619_v3  ;;  %569 = vmatprep.mubr.msk.bf16.mxu0 %vm646_vm0, %v644_v2  ;;  %s823_s0 = smov (!%p76_p0, %s814_s0), 39  ;;  %v624_v9 = vld [vmem:[%s813_s4 + $0x10] sm:$0xff]   ;;  %v625_v12 = vld [vmem:[%s813_s4 + $0x8] sm:$0xff]   ;;  %v626_v14 = vld [vmem:[%s813_s4] sm:$0xff]  }
   0x4   :  { %555 = vmatprep.subr.bf16.mxu0 %v644_v2  ;;  %589 = vmatprep.mubr.msk.bf16.mxu1 %vm646_vm0, %v644_v2  ;;  %s524_s24 = sshll.u32 %s823_s0, 6  ;;  %v494_v19 = vld [vmem:[%s817_s2] ss:$0 sm:$0xff]  ;;  %v495_v20 = vld [vmem:[%s817_s2 + $0x1] ss:$0 sm:$0xff]  ;;  %s85_s21 = scalar_lea.vmem %s819_s6, %s823_s0 }
   0x5   :  { %s740_s29 = scalar_lea.vmem %s815_s5, %s524_s24  ;;  %s757_s14 = scalar_lea.vmem %s816_s7, %s524_s24  ;;  %v496_v24 = vld [vmem:[%s818_s3] ss:$0 sm:$0xff]  ;;  %v497_v37 = vld [vmem:[%s818_s3 + $0x1] ss:$0 sm:$0xff] }
   0x6   :  { %618 = vset.pattern.permute.xlu0 %v645_v5  ;;  %v627_v10 = vld [vmem:[%s740_s29 + $0x38] sm:$0xff]   ;;  %v628_v11 = vld [vmem:[%s740_s29 + $0x30] sm:$0xff]   ;;  %v629_v13 = vld [vmem:[%s740_s29 + $0x28] sm:$0xff]   ;;  %s97_s23 = scalar_lea.vmem %s820_s8, %s823_s0 }
   0x7   :  { %114 = vperm.xlu0 %618, %v100_v1   ;;  %556 = vmatpush3.bf16.msra.mxu0 %v620_v4  ;;  %v630_v15 = vld [vmem:[%s740_s29 + $0x20] sm:$0xff]   ;;  %v631_v16 = vld [vmem:[%s740_s29 + $0x18] sm:$0xff]   ;;  %v632_v17 = vld [vmem:[%s740_s29 + $0x10] sm:$0xff]  }
   0x8   :  { %557 = vmatprep.subr.bf16.mxu0 %v644_v2  ;;  %574 = vmatpush3.bf16.msra.mxu1 %v627_v10  ;;  %v633_v29 = vld [vmem:[%s740_s29 + $0x8] sm:$0xff]   ;;  %v634_v30 = vld [vmem:[%s740_s29] sm:$0xff]   ;;  %v635_v31 = vld [vmem:[%s757_s14 + $0x38] sm:$0xff]  }
   0x9   :  { %575 = vmatprep.subr.bf16.mxu1 %v644_v2  ;;  %v636_v32 = vld [vmem:[%s757_s14 + $0x30] sm:$0xff]   ;;  %v637_v33 = vld [vmem:[%s757_s14 + $0x28] sm:$0xff]   ;;  %v638_v34 = vld [vmem:[%s757_s14 + $0x20] sm:$0xff]  }
   0xa   :  { %v639_v35 = vld [vmem:[%s757_s14 + $0x18] sm:$0xff]   ;;  %v640_v36 = vld [vmem:[%s757_s14 + $0x10] sm:$0xff]   ;;  %v641_v45 = vld [vmem:[%s757_s14 + $0x8] sm:$0xff]  }
   0xb   :  { %558 = vmatpush3.bf16.msra.mxu0 %v621_v6  ;;  %v642_v46 = vld [vmem:[%s757_s14] sm:$0xff]  }
   0xc   :  { %559 = vmatprep.subr.bf16.mxu0 %v644_v2  ;;  %576 = vmatpush3.bf16.msra.mxu1 %v628_v11  ;;  %v506_v47 = vld [vmem:[%s85_s21] ss:$0 sm:$0xff] }
   0xd   :  { %577 = vmatprep.subr.bf16.mxu1 %v644_v2  ;;  %v515_v55 = vld [vmem:[%s97_s23] ss:$0 sm:$0xff] }
   0xf   :  { %560 = vmatpush3.bf16.msra.mxu0 %v622_v7 }
  0x10   :  { %561 = vmatprep.subr.bf16.mxu0 %v644_v2  ;;  %578 = vmatpush3.bf16.msra.mxu1 %v629_v13 }
  0x11   :  { %579 = vmatprep.subr.bf16.mxu1 %v644_v2 }
  0x13   :  { %562 = vmatpush3.bf16.msra.mxu0 %v623_v8 }
  0x14   :  { %563 = vmatprep.subr.bf16.mxu0 %v644_v2  ;;  %580 = vmatpush3.bf16.msra.mxu1 %v630_v15 }
  0x15   :  { %581 = vmatprep.subr.bf16.mxu1 %v644_v2 }
  0x17   :  { %564 = vmatpush3.bf16.msra.mxu0 %v624_v9 }
  0x18   :  { %565 = vmatprep.subr.bf16.mxu0 %v644_v2  ;;  %582 = vmatpush3.bf16.msra.mxu1 %v631_v16 }
  0x19   :  { %583 = vmatprep.subr.bf16.mxu1 %v644_v2 }
  0x1b   :  { %566 = vmatpush3.bf16.msra.mxu0 %v625_v12 }
  0x1c   :  { %567 = vmatprep.subr.bf16.mxu0 %v644_v2  ;;  %584 = vmatpush3.bf16.msra.mxu1 %v632_v17 }
  0x1d   :  { %585 = vmatprep.subr.bf16.mxu1 %v644_v2 }
  0x1f   :  { %568 = vmatpush3.bf16.msra.mxu0 %v626_v14 }
  0x20   :  { %593 = vmatprep.subr.bf16.mxu0 %v644_v2  ;;  %586 = vmatpush3.bf16.msra.mxu1 %v633_v29 }
  0x21   :  { %587 = vmatprep.subr.bf16.mxu1 %v644_v2 }
  0x24   :  { %588 = vmatpush3.bf16.msra.mxu1 %v634_v30 }
  0x7d   :  { %v105_v18 = vpop.permute.xlu0 %104 }
  0x7e   :  { %v111_v22 = vmul.f32 %v494_v19, %v105_v18 }
  0x82   :  { %v115_v21 = vpop.permute.xlu0 %114 }
  0x83   :  { %v121_v23 = vmul.f32 %v495_v20, %v115_v21 }
  0x85   :  { %v122_v25 = vadd.f32 %v121_v23, %v111_v22 }
  0x87   :  { %v128_v26 = vadd.f32 %v496_v24, %v122_v25 }
  0x89   :  { %v129_v27 = vmax.f32 %v128_v26, 0.0 }
  0x8b   :  { %v130_v28 = vpack.c.bf16 %v129_v27, %v129_v27 }
  0x8d   :  { %570 = vmatmul.mubr.bf16.vlgmr.msra.gmra.mxu0 %v130_v28 }
  0x8e   :  { %609 = vmatprep.mubr.msk.bf16.mxu0 %vm646_vm0, %v644_v2  ;;  %594 = vmatpush3.bf16.msra.mxu0 %v635_v31 }
  0x8f   :  { %595 = vmatprep.subr.bf16.mxu0 %v644_v2 }
  0x92   :  { %596 = vmatpush3.bf16.msra.mxu0 %v636_v32 }
  0x93   :  { %597 = vmatprep.subr.bf16.mxu0 %v644_v2 }
  0x96   :  { %598 = vmatpush3.bf16.msra.mxu0 %v637_v33 }
  0x97   :  { %599 = vmatprep.subr.bf16.mxu0 %v644_v2 }
  0x9a   :  { %600 = vmatpush3.bf16.msra.mxu0 %v638_v34 }
  0x9b   :  { %601 = vmatprep.subr.bf16.mxu0 %v644_v2 }
  0x9e   :  { %602 = vmatpush3.bf16.msra.mxu0 %v639_v35 }
  0x9f   :  { %603 = vmatprep.subr.bf16.mxu0 %v644_v2 }
  0xa2   :  { %604 = vmatpush3.bf16.msra.mxu0 %v640_v36 }
  0xa3   :  { %605 = vmatprep.subr.bf16.mxu0 %v644_v2 }
  0xa6   :  { %606 = vmatpush3.bf16.msra.mxu0 %v641_v45 }
  0xa7   :  { %607 = vmatprep.subr.bf16.mxu0 %v644_v2 }
  0xaa   :  { %608 = vmatpush3.bf16.msra.mxu0 %v642_v46 }
 0x14d   :  { %v234_v38 = vpop.f32.mrf.mxu0 }
 0x14e   :  { %v235_v39 = vadd.f32 %v497_v37, %v234_v38 }
 0x14f   :  { %v571_v40 = vpop.f32.mrf.mxu0 }
 0x150   :  { %v240_v41 = vmax.f32 %v235_v39, 0.0 }
 0x151   :  { %v237_v42 = vpop.f32.mrf.mxu0 }
 0x152   :  { %v241_v43 = vpack.c.bf16 %v240_v41, %v240_v41 }
 0x153   :  { %v572_v44 = vpop.f32.mrf.mxu0 }
 0x154   :  { %590 = vmatmul.mubr.bf16.vlgmr.msra.gmra.mxu1 %v241_v43 }
 0x214   :  { %v347_v48 = vpop.f32.mrf.mxu1 }
 0x215   :  { %v348_v49 = vadd.f32 %v506_v47, %v347_v48 }
 0x216   :  { %v591_v50 = vpop.f32.mrf.mxu1 }
 0x217   :  { %v353_v51 = vmax.f32 %v348_v49, 0.0 }
 0x218   :  { %v350_v52 = vpop.f32.mrf.mxu1 }
 0x219   :  { %v354_v53 = vpack.c.bf16 %v353_v51, %v353_v51 }
 0x21a   :  { %v592_v54 = vpop.f32.mrf.mxu1 }
 0x21b   :  { %610 = vmatmul.mubr.bf16.vlgmr.msra.gmra.mxu0 %v354_v53 }
 0x2db   :  { %v460_v56 = vpop.f32.mrf.mxu0 }
 0x2dc   :  { %v461_v57 = vadd.f32 %v515_v55, %v460_v56 }
 0x2dd   :  { %v611_v58 = vpop.f32.mrf.mxu0 }
 0x2de   :  { %467 = vst.msk [vmem:[%s821_s9] sm:$0xff] %vm466_vm1, %v461_v57 }
 0x2df   :  { %v463_v59 = vpop.f32.mrf.mxu0 }
 0x2e1   :  { %v612_v60 = vpop.f32.mrf.mxu0 }

</bundles_post_ra>
